<compile_context>
chip_gen: v7x
topology: tpu7x:2x2x1
jax: 0.10.0
libtpu: 0.0.40
codegen_flags: <defaults>
</compile_context>

<pallas_src>
import functools
import math

import jax
import jax.numpy as jnp
from jax.experimental import pallas as pl
from jax.experimental.pallas import tpu as pltpu


# ---------------------------------------------------------------------------
# Kernel bodies
# ---------------------------------------------------------------------------

def _attend_and_store(q, k, v, o_ref, *, bt, seq_len, hidden_size):
    """Scaled dot-product attention on bf16 q/k/v rows (bt*seq_len, H)."""
    S, H = seq_len, hidden_size
    # Leading-dim reshapes are layout-free: bt == 1 just adds a unit dim, and
    # bt > 1 is only selected by the wrapper when S % 16 == 0 (bf16 sublanes).
    q = q.reshape(bt, S, H)
    k = k.reshape(bt, S, H)
    v = v.reshape(bt, S, H)

    # Scores contract the LAST dim of q and k -> MXU consumes k directly
    # (no materialized transpose).  f32 accumulation, f32 softmax math.
    scores = jnp.einsum("bqh,bkh->bqk", q, k,
                        preferred_element_type=jnp.float32)
    scores = scores * (1.0 / math.sqrt(H))

    # TODO(synk): nn.Dropout(0.2) on the scores is identity in eval/inference
    # mode; training-mode stochastic dropout (pltpu.prng_random_bits + mask)
    # intentionally omitted.
    # TODO(synk): for large S (~2K+), switch to a query-tiled online softmax
    # (flash-style) so the 3 live (bt, S, S) f32 blocks never exceed VMEM
    # (matters first on v7x's 64 MiB); unnecessary at these sizes.

    m = jnp.max(scores, axis=-1, keepdims=True)
    e = jnp.exp(scores - m)
    denom = jnp.sum(e, axis=-1, keepdims=True)
    # Exact reciprocal still lands on the otherwise-idle EUP slot and keeps
    # parity with the f32 PyTorch reference tighter than approx=True.
    inv = pl.reciprocal(denom, approx=False)

    if S > H:
        # Normalize the smaller (bt, S, H) output instead of (bt, S, S) probs.
        out = jnp.einsum("bqk,bkh->bqh", e.astype(jnp.bfloat16), v,
                         preferred_element_type=jnp.float32) * inv
    else:
        p = (e * inv).astype(jnp.bfloat16)
        out = jnp.einsum("bqk,bkh->bqh", p, v,
                         preferred_element_type=jnp.float32)

    out = out.astype(o_ref.dtype)
    o_ref[...] = out if bt > 1 else out[0]


def _gat_kernel_split(x_ref, wq_ref, bq_ref, wk_ref, bk_ref, wv_ref, bv_ref,
                      o_ref, *, bt, seq_len, hidden_size):
    """Three separate (H, H) projections (used when H is not 128-aligned)."""
    S, H = seq_len, hidden_size
    rows = x_ref[...] if bt == 1 else x_ref[...].reshape(bt * S, H)

    def project(w_ref, b_ref):
        r = jnp.dot(rows, w_ref[...], preferred_element_type=jnp.float32)
        # Single bf16 cast immediately after the f32 bias add.
        return (r + b_ref[...]).astype(jnp.bfloat16)

    q = project(wq_ref, bq_ref)
    k = project(wk_ref, bk_ref)
    v = project(wv_ref, bv_ref)
    _attend_and_store(q, k, v, o_ref, bt=bt, seq_len=S, hidden_size=H)


def _gat_kernel_fused(x_ref, wqkv_ref, bqkv_ref, o_ref, *, bt, seq_len,
                      hidden_size):
    """Fused (H, 3H) projection; only used when H % 128 == 0 so the q/k/v
    lane slices fall on vreg tile boundaries (free)."""
    S, H = seq_len, hidden_size
    rows = x_ref[...] if bt == 1 else x_ref[...].reshape(bt * S, H)
    qkv = jnp.dot(rows, wqkv_ref[...], preferred_element_type=jnp.float32)
    qkv = (qkv + bqkv_ref[...]).astype(jnp.bfloat16)   # one cast, then slice
    q = qkv[:, :H]
    k = qkv[:, H:2 * H]
    v = qkv[:, 2 * H:]
    _attend_and_store(q, k, v, o_ref, bt=bt, seq_len=S, hidden_size=H)


# ---------------------------------------------------------------------------
# Tiling / VMEM budgeting
# ---------------------------------------------------------------------------

_VMEM_BUDGET_BYTES = 40 * 1024 * 1024   # conservative for v7x (64 MiB physical)


def _step_vmem_bytes(bt, S, H):
    """Per-grid-step VMEM footprint estimate (bytes)."""
    rows = bt * S
    x_io = 2 * rows * H * 2                      # double-buffered bf16 x tile
    out_io = 2 * rows * H * 4                    # double-buffered f32 out tile
    wgts = 2 * (3 * H * H * 2 + 3 * H * 4)       # weights bf16 + biases f32
    proj = rows * 3 * H * (4 + 2)                # f32 qkv acc + bf16 q/k/v
    attn = 3 * bt * S * S * 4                    # scores / e / p in f32
    return x_io + out_io + wgts + proj + attn


def _pick_batch_tile(B, S, H):
    """Batch elements per grid step (generation-aware)."""
    # Row target sized for the 256-wide MXU on v6e/v7x (fine on v5e too) and
    # to amortize the ~0.35us per-grid-step overhead.
    row_target = 256
    # v7x has 2 TensorCores: keep the "parallel" grid length >= 2.
    bt_cap = 1 if B <= 1 else B // 2
    # Bt > 1 merges (Bt, S) rows in-kernel; only layout-free when S is a
    # multiple of the bf16 sublane pack (16).
    if S % 16 != 0:
        bt_cap = 1
    candidates = [d for d in range(1, bt_cap + 1)
                  if B % d == 0 and _step_vmem_bytes(d, S, H) <= _VMEM_BUDGET_BYTES]
    if not candidates:
        return 1
    reaching = [d for d in candidates if d * S >= row_target]
    return min(reaching) if reaching else max(candidates)


# ---------------------------------------------------------------------------
# Wrapper
# ---------------------------------------------------------------------------

def _io_spec(bt, S, H):
    if bt == 1:
        # Squeeze the leading batch dim: kernel sees a 2D (S, H) slab; last
        # two block dims equal the full array dims -> always layout-legal.
        return pl.BlockSpec((None, S, H), lambda b: (b, 0, 0))
    return pl.BlockSpec((bt, S, H), lambda b: (b, 0, 0))


def _const_spec(shape, single_buffer):
    n = len(shape)
    if single_buffer:
        # Constant index map -> DMA'd once; single buffering halves its VMEM.
        return pl.BlockSpec(shape, lambda b: (0,) * n,
                            pipeline_mode=pl.Buffered(1))
    return pl.BlockSpec(shape, lambda b: (0,) * n)


def graph_attention_layer(x, wq, bq, wk, bk, wv, bv):
    """x: (B, S, H) float32.  w*: (H, H) PyTorch layout (out, in).  b*: (H,)."""
    B, S, H = x.shape
    out_dtype = x.dtype
    # TODO(synk): emit a bf16 output (out_dtype=jnp.bfloat16) if downstream
    # accepts it -- cuts ~2/3 of HBM write traffic (biggest win on v5e).

    Bt = _pick_batch_tile(B, S, H)
    grid = (B // Bt,)
    vmem_limit = int(min(max(2 * _step_vmem_bytes(Bt, S, H), 32 << 20), 64 << 20))

    x_bf16 = x.astype(jnp.bfloat16)

    fused = (H % 128 == 0)
    if fused:
        # Lane-aligned fused projection: one (H, 3H) weight slab, free slices.
        wqkv = jnp.concatenate([wq.T, wk.T, wv.T], axis=1).astype(jnp.bfloat16)
        bqkv = jnp.concatenate([bq, bk, bv]).reshape(1, 3 * H).astype(jnp.float32)
        const_args = (wqkv, bqkv)
        const_shapes = ((H, 3 * H), (1, 3 * H))
        kern = functools.partial(_gat_kernel_fused, bt=Bt, seq_len=S,
                                 hidden_size=H)
    else:
        # Small / unaligned H (demo H=32): three separate matmuls -- slicing a
        # fused (., 3H) result at non-128 lane offsets would relayout.
        const_args = (wq.T.astype(jnp.bfloat16), bq.reshape(1, H).astype(jnp.float32),
                      wk.T.astype(jnp.bfloat16), bk.reshape(1, H).astype(jnp.float32),
                      wv.T.astype(jnp.bfloat16), bv.reshape(1, H).astype(jnp.float32))
        const_shapes = ((H, H), (1, H)) * 3
        kern = functools.partial(_gat_kernel_split, bt=Bt, seq_len=S,
                                 hidden_size=H)

    # NOTE: the demo H=32 fills only 32/128 lanes (masked vst). Production use
    # should keep H a multiple of 128 (pad in the wrapper) for lane-dense,
    # unmasked stores -- the single biggest measured store-side lever.

    def run(single_buffer_consts):
        in_specs = [_io_spec(Bt, S, H)]
        in_specs += [_const_spec(shp, single_buffer_consts) for shp in const_shapes]
        fn = pl.pallas_call(
            kern,
            out_shape=jax.ShapeDtypeStruct((B, S, H), out_dtype),
            grid_spec=pltpu.PrefetchScalarGridSpec(
                num_scalar_prefetch=0,
                grid=grid,
                in_specs=in_specs,
                out_specs=_io_spec(Bt, S, H),
            ),
            compiler_params=pltpu.CompilerParams(
                dimension_semantics=("parallel",),
                vmem_limit_bytes=vmem_limit),
        )
        return fn(x_bf16, *const_args)

    try:
        out = run(True)
        jax.block_until_ready(out)
        return out
    except Exception:
        # Fallback for jax builds where pipeline_mode=pl.Buffered is not
        # supported by the TPU pallas_call pipeline.
        return run(False)


# ---------------------------------------------------------------------------
# Reference & demo
# ---------------------------------------------------------------------------

def _reference(x, wq, bq, wk, bk, wv, bv):
    # Pure-JAX reference mirroring the PyTorch forward (eval-mode dropout).
    H = x.shape[-1]
    q = jnp.einsum("bsh,oh->bso", x, wq) + bq
    k = jnp.einsum("bsh,oh->bso", x, wk) + bk
    v = jnp.einsum("bsh,oh->bso", x, wv) + bv
    scores = jnp.einsum("bqh,bkh->bqk", q, k) / math.sqrt(H)
    w = jax.nn.softmax(scores, axis=-1)
    return jnp.einsum("bqk,bkh->bqh", w, v)


if __name__ == "__main__":
    B, S, H = 2, 8, 32  # batch, seq_len, hidden_size (num_heads unused in forward)

    key = jax.random.PRNGKey(0)
    kx, kwq, kbq, kwk, kbk, kwv, kbv = jax.random.split(key, 7)

    x = jax.random.normal(kx, (B, S, H), dtype=jnp.float32)

    # Deterministic parameter init (PyTorch Linear layout: W is (out, in)).
    bound = 1.0 / math.sqrt(H)
    wq = jax.random.uniform(kwq, (H, H), jnp.float32, -bound, bound)
    bq = jax.random.uniform(kbq, (H,), jnp.float32, -bound, bound)
    wk = jax.random.uniform(kwk, (H, H), jnp.float32, -bound, bound)
    bk = jax.random.uniform(kbk, (H,), jnp.float32, -bound, bound)
    wv = jax.random.uniform(kwv, (H, H), jnp.float32, -bound, bound)
    bv = jax.random.uniform(kbv, (H,), jnp.float32, -bound, bound)

    out = graph_attention_layer(x, wq, bq, wk, bk, wv, bv)
    out = jax.block_until_ready(out)

    ref = _reference(x, wq, bq, wk, bk, wv, bv)
    assert out.shape == (B, S, H)
    assert out.dtype == x.dtype
    # Tolerance for bf16 MXU inputs (f32 accumulation, exact reciprocal).
    assert jnp.allclose(out, ref, atol=2e-2, rtol=2e-2), "mismatch vs reference"

    print("KERNEL_OK")
</pallas_src>

<mosaic_0001>
module attributes {stable_mosaic.version = 11 : i64} {
  func.func @_gat_kernel_split(%arg0: i32, %arg1: memref<1x8x32xbf16, #tpu.memory_space<vmem>>, %arg2: memref<32x32xbf16, #tpu.memory_space<vmem>>, %arg3: memref<1x32xf32, #tpu.memory_space<vmem>>, %arg4: memref<32x32xbf16, #tpu.memory_space<vmem>>, %arg5: memref<1x32xf32, #tpu.memory_space<vmem>>, %arg6: memref<32x32xbf16, #tpu.memory_space<vmem>>, %arg7: memref<1x32xf32, #tpu.memory_space<vmem>>, %arg8: memref<1x8x32xf32, #tpu.memory_space<vmem>>) attributes {dimension_semantics = [#tpu.dimension_semantics<parallel>], iteration_bounds = array<i64: 2>, scalar_prefetch = 0 : i64, scratch_operands = 0 : i64, tpu.core_type = #tpu.core_type<tc>, window_params = [{transform_indices = @transform_0, window_bounds = array<i64: 1, 8, 32>}, {pipeline_mode = #tpu.pipeline_mode<synchronous>, transform_indices = @transform_1, window_bounds = array<i64: 32, 32>}, {pipeline_mode = #tpu.pipeline_mode<synchronous>, transform_indices = @transform_2, window_bounds = array<i64: 1, 32>}, {pipeline_mode = #tpu.pipeline_mode<synchronous>, transform_indices = @transform_3, window_bounds = array<i64: 32, 32>}, {pipeline_mode = #tpu.pipeline_mode<synchronous>, transform_indices = @transform_4, window_bounds = array<i64: 1, 32>}, {pipeline_mode = #tpu.pipeline_mode<synchronous>, transform_indices = @transform_5, window_bounds = array<i64: 32, 32>}, {pipeline_mode = #tpu.pipeline_mode<synchronous>, transform_indices = @transform_6, window_bounds = array<i64: 1, 32>}, {transform_indices = @transform_7, window_bounds = array<i64: 1, 8, 32>}]} {
    %c0 = arith.constant 0 : index
    %c0_0 = arith.constant 0 : index
    %c0_1 = arith.constant 0 : index
    %0 = vector.load %arg1[%c0, %c0_0, %c0_1] : memref<1x8x32xbf16, #tpu.memory_space<vmem>>, vector<1x8x32xbf16>
    %1 = vector.shape_cast %0 : vector<1x8x32xbf16> to vector<8x32xbf16>
    %c0_2 = arith.constant 0 : index
    %c0_3 = arith.constant 0 : index
    %2 = vector.load %arg2[%c0_2, %c0_3] : memref<32x32xbf16, #tpu.memory_space<vmem>>, vector<32x32xbf16>
    %cst = arith.constant dense<0.000000e+00> : vector<8x32xf32>
    %3 = tpu.matmul %1, %2, %cst {dimension_numbers = #tpu.dot_dimension_numbers<[1], [0], [0], [1], [0, 0, 1, 1], [], []>} : vector<8x32xbf16>, vector<32x32xbf16>, vector<8x32xf32> -> vector<8x32xf32>
    %c0_4 = arith.constant 0 : index
    %c0_5 = arith.constant 0 : index
    %4 = vector.load %arg3[%c0_4, %c0_5] : memref<1x32xf32, #tpu.memory_space<vmem>>, vector<1x32xf32>
    %5 = vector.broadcast %4 : vector<1x32xf32> to vector<8x32xf32>
    %6 = arith.addf %3, %5 : vector<8x32xf32>
    %7 = arith.truncf %6 : vector<8x32xf32> to vector<8x32xbf16>
    %c0_6 = arith.constant 0 : index
    %c0_7 = arith.constant 0 : index
    %8 = vector.load %arg4[%c0_6, %c0_7] : memref<32x32xbf16, #tpu.memory_space<vmem>>, vector<32x32xbf16>
    %cst_8 = arith.constant dense<0.000000e+00> : vector<8x32xf32>
    %9 = tpu.matmul %1, %8, %cst_8 {dimension_numbers = #tpu.dot_dimension_numbers<[1], [0], [0], [1], [0, 0, 1, 1], [], []>} : vector<8x32xbf16>, vector<32x32xbf16>, vector<8x32xf32> -> vector<8x32xf32>
    %c0_9 = arith.constant 0 : index
    %c0_10 = arith.constant 0 : index
    %10 = vector.load %arg5[%c0_9, %c0_10] : memref<1x32xf32, #tpu.memory_space<vmem>>, vector<1x32xf32>
    %11 = vector.broadcast %10 : vector<1x32xf32> to vector<8x32xf32>
    %12 = arith.addf %9, %11 : vector<8x32xf32>
    %13 = arith.truncf %12 : vector<8x32xf32> to vector<8x32xbf16>
    %c0_11 = arith.constant 0 : index
    %c0_12 = arith.constant 0 : index
    %14 = vector.load %arg6[%c0_11, %c0_12] : memref<32x32xbf16, #tpu.memory_space<vmem>>, vector<32x32xbf16>
    %cst_13 = arith.constant dense<0.000000e+00> : vector<8x32xf32>
    %15 = tpu.matmul %1, %14, %cst_13 {dimension_numbers = #tpu.dot_dimension_numbers<[1], [0], [0], [1], [0, 0, 1, 1], [], []>} : vector<8x32xbf16>, vector<32x32xbf16>, vector<8x32xf32> -> vector<8x32xf32>
    %c0_14 = arith.constant 0 : index
    %c0_15 = arith.constant 0 : index
    %16 = vector.load %arg7[%c0_14, %c0_15] : memref<1x32xf32, #tpu.memory_space<vmem>>, vector<1x32xf32>
    %17 = vector.broadcast %16 : vector<1x32xf32> to vector<8x32xf32>
    %18 = arith.addf %15, %17 : vector<8x32xf32>
    %19 = arith.truncf %18 : vector<8x32xf32> to vector<8x32xbf16>
    %20 = vector.shape_cast %7 : vector<8x32xbf16> to vector<1x8x32xbf16>
    %21 = vector.shape_cast %13 : vector<8x32xbf16> to vector<1x8x32xbf16>
    %22 = vector.shape_cast %19 : vector<8x32xbf16> to vector<1x8x32xbf16>
    "tpu.trace_start"() <{level = 10 : i32, message = "bqh,bkh->bqk"}> : () -> ()
    %cst_16 = arith.constant dense<0.000000e+00> : vector<1x8x8xf32>
    %23 = tpu.matmul %20, %21, %cst_16 {dimension_numbers = #tpu.dot_dimension_numbers<[2], [2], [1], [1], [0, 0, 0, 1, 1, 1], [0], [0]>} : vector<1x8x32xbf16>, vector<1x8x32xbf16>, vector<1x8x8xf32> -> vector<1x8x8xf32>
    "tpu.trace_stop"() : () -> ()
    %cst_17 = arith.constant 0.176776692 : f32
    %24 = vector.broadcast %cst_17 : f32 to vector<1x8x8xf32>
    %25 = arith.mulf %23, %24 : vector<1x8x8xf32>
    %cst_18 = arith.constant dense<0xFF800000> : vector<1x8xf32>
    %26 = vector.multi_reduction <maximumf>, %25, %cst_18 [2] : vector<1x8x8xf32> to vector<1x8xf32>
    %27 = vector.shape_cast %26 : vector<1x8xf32> to vector<1x8x1xf32>
    %28 = vector.broadcast %27 : vector<1x8x1xf32> to vector<1x8x8xf32>
    %29 = arith.subf %25, %28 : vector<1x8x8xf32>
    %30 = math.exp %29 : vector<1x8x8xf32>
    %cst_19 = arith.constant dense<0.000000e+00> : vector<1x8xf32>
    %31 = vector.multi_reduction <add>, %30, %cst_19 [2] : vector<1x8x8xf32> to vector<1x8xf32>
    %32 = vector.shape_cast %31 : vector<1x8xf32> to vector<1x8x1xf32>
    %33 = tpu.reciprocal %32 : vector<1x8x1xf32> -> vector<1x8x1xf32>
    %34 = vector.broadcast %33 : vector<1x8x1xf32> to vector<1x8x8xf32>
    %35 = arith.mulf %30, %34 : vector<1x8x8xf32>
    %36 = arith.truncf %35 : vector<1x8x8xf32> to vector<1x8x8xbf16>
    "tpu.trace_start"() <{level = 10 : i32, message = "bqk,bkh->bqh"}> : () -> ()
    %cst_20 = arith.constant dense<0.000000e+00> : vector<1x8x32xf32>
    %37 = tpu.matmul %36, %22, %cst_20 {dimension_numbers = #tpu.dot_dimension_numbers<[2], [1], [1], [2], [0, 0, 0, 1, 1, 2], [0], [0]>} : vector<1x8x8xbf16>, vector<1x8x32xbf16>, vector<1x8x32xf32> -> vector<1x8x32xf32>
    "tpu.trace_stop"() : () -> ()
    %38 = vector.shape_cast %37 : vector<1x8x32xf32> to vector<8x32xf32>
    %c0_21 = arith.constant 0 : index
    %c0_22 = arith.constant 0 : index
    %c0_23 = arith.constant 0 : index
    %39 = vector.load %arg8[%c0_21, %c0_22, %c0_23] : memref<1x8x32xf32, #tpu.memory_space<vmem>>, vector<1x8x32xf32>
    %40 = vector.shape_cast %39 : vector<1x8x32xf32> to vector<8x32xf32>
    %41 = vector.shape_cast %38 : vector<8x32xf32> to vector<1x8x32xf32>
    tpu.vector_store %arg8[%c0_21, %c0_22, %c0_23], %41 {strides = array<i32>} : memref<1x8x32xf32, #tpu.memory_space<vmem>>, vector<1x8x32xf32>,
    return
  }
  func.func @transform_0(%arg0: i32) -> (i32, i32, i32) {
    %c0_i32 = arith.constant 0 : i32
    %c0_i32_0 = arith.constant 0 : i32
    %c0_i32_1 = arith.constant 0 : i32
    return %arg0, %c0_i32, %c0_i32_0 : i32, i32, i32
  }
  func.func @transform_1(%arg0: i32) -> (i32, i32) {
    %c0_i32 = arith.constant 0 : i32
    %c0_i32_0 = arith.constant 0 : i32
    %c0_i32_1 = arith.constant 0 : i32
    return %c0_i32, %c0_i32_0 : i32, i32
  }
  func.func @transform_2(%arg0: i32) -> (i32, i32) {
    %c0_i32 = arith.constant 0 : i32
    %c0_i32_0 = arith.constant 0 : i32
    %c0_i32_1 = arith.constant 0 : i32
    return %c0_i32, %c0_i32_0 : i32, i32
  }
  func.func @transform_3(%arg0: i32) -> (i32, i32) {
    %c0_i32 = arith.constant 0 : i32
    %c0_i32_0 = arith.constant 0 : i32
    %c0_i32_1 = arith.constant 0 : i32
    return %c0_i32, %c0_i32_0 : i32, i32
  }
  func.func @transform_4(%arg0: i32) -> (i32, i32) {
    %c0_i32 = arith.constant 0 : i32
    %c0_i32_0 = arith.constant 0 : i32
    %c0_i32_1 = arith.constant 0 : i32
    return %c0_i32, %c0_i32_0 : i32, i32
  }
  func.func @transform_5(%arg0: i32) -> (i32, i32) {
    %c0_i32 = arith.constant 0 : i32
    %c0_i32_0 = arith.constant 0 : i32
    %c0_i32_1 = arith.constant 0 : i32
    return %c0_i32, %c0_i32_0 : i32, i32
  }
  func.func @transform_6(%arg0: i32) -> (i32, i32) {
    %c0_i32 = arith.constant 0 : i32
    %c0_i32_0 = arith.constant 0 : i32
    %c0_i32_1 = arith.constant 0 : i32
    return %c0_i32, %c0_i32_0 : i32, i32
  }
  func.func @transform_7(%arg0: i32) -> (i32, i32, i32) {
    %c0_i32 = arith.constant 0 : i32
    %c0_i32_0 = arith.constant 0 : i32
    %c0_i32_1 = arith.constant 0 : i32
    return %arg0, %c0_i32, %c0_i32_0 : i32, i32, i32
  }
}

module attributes {stable_mosaic.version = 11 : i64} {
  func.func @_gat_kernel_split(%arg0: i32, %arg1: memref<1x8x32xbf16, #tpu.memory_space<vmem>>, %arg2: memref<32x32xbf16, #tpu.memory_space<vmem>>, %arg3: memref<1x32xf32, #tpu.memory_space<vmem>>, %arg4: memref<32x32xbf16, #tpu.memory_space<vmem>>, %arg5: memref<1x32xf32, #tpu.memory_space<vmem>>, %arg6: memref<32x32xbf16, #tpu.memory_space<vmem>>, %arg7: memref<1x32xf32, #tpu.memory_space<vmem>>, %arg8: memref<1x8x32xf32, #tpu.memory_space<vmem>>) attributes {dimension_semantics = [#tpu.dimension_semantics<parallel>], iteration_bounds = array<i64: 2>, scalar_prefetch = 0 : i64, scratch_operands = 0 : i64, tpu.core_type = #tpu.core_type<tc>, window_params = [{transform_indices = @transform_0, window_bounds = array<i64: 1, 8, 32>}, {pipeline_mode = #tpu.pipeline_mode<synchronous>, transform_indices = @transform_1, window_bounds = array<i64: 32, 32>}, {pipeline_mode = #tpu.pipeline_mode<synchronous>, transform_indices = @transform_2, window_bounds = array<i64: 1, 32>}, {pipeline_mode = #tpu.pipeline_mode<synchronous>, transform_indices = @transform_3, window_bounds = array<i64: 32, 32>}, {pipeline_mode = #tpu.pipeline_mode<synchronous>, transform_indices = @transform_4, window_bounds = array<i64: 1, 32>}, {pipeline_mode = #tpu.pipeline_mode<synchronous>, transform_indices = @transform_5, window_bounds = array<i64: 32, 32>}, {pipeline_mode = #tpu.pipeline_mode<synchronous>, transform_indices = @transform_6, window_bounds = array<i64: 1, 32>}, {transform_indices = @transform_7, window_bounds = array<i64: 1, 8, 32>}]} {
    %c0 = arith.constant 0 : index
    %c0_0 = arith.constant 0 : index
    %c0_1 = arith.constant 0 : index
    %0 = vector.load %arg1[%c0, %c0_0, %c0_1] : memref<1x8x32xbf16, #tpu.memory_space<vmem>>, vector<1x8x32xbf16>
    %1 = vector.shape_cast %0 : vector<1x8x32xbf16> to vector<8x32xbf16>
    %c0_2 = arith.constant 0 : index
    %c0_3 = arith.constant 0 : index
    %2 = vector.load %arg2[%c0_2, %c0_3] : memref<32x32xbf16, #tpu.memory_space<vmem>>, vector<32x32xbf16>
    %cst = arith.constant dense<0.000000e+00> : vector<8x32xf32>
    %3 = tpu.matmul %1, %2, %cst {dimension_numbers = #tpu.dot_dimension_numbers<[1], [0], [0], [1], [0, 0, 1, 1], [], []>} : vector<8x32xbf16>, vector<32x32xbf16>, vector<8x32xf32> -> vector<8x32xf32>
    %c0_4 = arith.constant 0 : index
    %c0_5 = arith.constant 0 : index
    %4 = vector.load %arg3[%c0_4, %c0_5] : memref<1x32xf32, #tpu.memory_space<vmem>>, vector<1x32xf32>
    %5 = vector.broadcast %4 : vector<1x32xf32> to vector<8x32xf32>
    %6 = arith.addf %3, %5 : vector<8x32xf32>
    %7 = arith.truncf %6 : vector<8x32xf32> to vector<8x32xbf16>
    %c0_6 = arith.constant 0 : index
    %c0_7 = arith.constant 0 : index
    %8 = vector.load %arg4[%c0_6, %c0_7] : memref<32x32xbf16, #tpu.memory_space<vmem>>, vector<32x32xbf16>
    %cst_8 = arith.constant dense<0.000000e+00> : vector<8x32xf32>
    %9 = tpu.matmul %1, %8, %cst_8 {dimension_numbers = #tpu.dot_dimension_numbers<[1], [0], [0], [1], [0, 0, 1, 1], [], []>} : vector<8x32xbf16>, vector<32x32xbf16>, vector<8x32xf32> -> vector<8x32xf32>
    %c0_9 = arith.constant 0 : index
    %c0_10 = arith.constant 0 : index
    %10 = vector.load %arg5[%c0_9, %c0_10] : memref<1x32xf32, #tpu.memory_space<vmem>>, vector<1x32xf32>
    %11 = vector.broadcast %10 : vector<1x32xf32> to vector<8x32xf32>
    %12 = arith.addf %9, %11 : vector<8x32xf32>
    %13 = arith.truncf %12 : vector<8x32xf32> to vector<8x32xbf16>
    %c0_11 = arith.constant 0 : index
    %c0_12 = arith.constant 0 : index
    %14 = vector.load %arg6[%c0_11, %c0_12] : memref<32x32xbf16, #tpu.memory_space<vmem>>, vector<32x32xbf16>
    %cst_13 = arith.constant dense<0.000000e+00> : vector<8x32xf32>
    %15 = tpu.matmul %1, %14, %cst_13 {dimension_numbers = #tpu.dot_dimension_numbers<[1], [0], [0], [1], [0, 0, 1, 1], [], []>} : vector<8x32xbf16>, vector<32x32xbf16>, vector<8x32xf32> -> vector<8x32xf32>
    %c0_14 = arith.constant 0 : index
    %c0_15 = arith.constant 0 : index
    %16 = vector.load %arg7[%c0_14, %c0_15] : memref<1x32xf32, #tpu.memory_space<vmem>>, vector<1x32xf32>
    %17 = vector.broadcast %16 : vector<1x32xf32> to vector<8x32xf32>
    %18 = arith.addf %15, %17 : vector<8x32xf32>
    %19 = arith.truncf %18 : vector<8x32xf32> to vector<8x32xbf16>
    %20 = vector.shape_cast %7 : vector<8x32xbf16> to vector<1x8x32xbf16>
    %21 = vector.shape_cast %13 : vector<8x32xbf16> to vector<1x8x32xbf16>
    %22 = vector.shape_cast %19 : vector<8x32xbf16> to vector<1x8x32xbf16>
    "tpu.trace_start"() <{level = 10 : i32, message = "bqh,bkh->bqk"}> : () -> ()
    %cst_16 = arith.constant dense<0.000000e+00> : vector<1x8x8xf32>
    %23 = tpu.matmul %20, %21, %cst_16 {dimension_numbers = #tpu.dot_dimension_numbers<[2], [2], [1], [1], [0, 0, 0, 1, 1, 1], [0], [0]>} : vector<1x8x32xbf16>, vector<1x8x32xbf16>, vector<1x8x8xf32> -> vector<1x8x8xf32>
    "tpu.trace_stop"() : () -> ()
    %cst_17 = arith.constant 0.176776692 : f32
    %24 = vector.broadcast %cst_17 : f32 to vector<1x8x8xf32>
    %25 = arith.mulf %23, %24 : vector<1x8x8xf32>
    %cst_18 = arith.constant dense<0xFF800000> : vector<1x8xf32>
    %26 = vector.multi_reduction <maximumf>, %25, %cst_18 [2] : vector<1x8x8xf32> to vector<1x8xf32>
    %27 = vector.shape_cast %26 : vector<1x8xf32> to vector<1x8x1xf32>
    %28 = vector.broadcast %27 : vector<1x8x1xf32> to vector<1x8x8xf32>
    %29 = arith.subf %25, %28 : vector<1x8x8xf32>
    %30 = math.exp %29 : vector<1x8x8xf32>
    %cst_19 = arith.constant dense<0.000000e+00> : vector<1x8xf32>
    %31 = vector.multi_reduction <add>, %30, %cst_19 [2] : vector<1x8x8xf32> to vector<1x8xf32>
    %32 = vector.shape_cast %31 : vector<1x8xf32> to vector<1x8x1xf32>
    %33 = tpu.reciprocal %32 : vector<1x8x1xf32> -> vector<1x8x1xf32>
    %34 = vector.broadcast %33 : vector<1x8x1xf32> to vector<1x8x8xf32>
    %35 = arith.mulf %30, %34 : vector<1x8x8xf32>
    %36 = arith.truncf %35 : vector<1x8x8xf32> to vector<1x8x8xbf16>
    "tpu.trace_start"() <{level = 10 : i32, message = "bqk,bkh->bqh"}> : () -> ()
    %cst_20 = arith.constant dense<0.000000e+00> : vector<1x8x32xf32>
    %37 = tpu.matmul %36, %22, %cst_20 {dimension_numbers = #tpu.dot_dimension_numbers<[2], [1], [1], [2], [0, 0, 0, 1, 1, 2], [0], [0]>} : vector<1x8x8xbf16>, vector<1x8x32xbf16>, vector<1x8x32xf32> -> vector<1x8x32xf32>
    "tpu.trace_stop"() : () -> ()
    %38 = vector.shape_cast %37 : vector<1x8x32xf32> to vector<8x32xf32>
    %c0_21 = arith.constant 0 : index
    %c0_22 = arith.constant 0 : index
    %c0_23 = arith.constant 0 : index
    %39 = vector.load %arg8[%c0_21, %c0_22, %c0_23] : memref<1x8x32xf32, #tpu.memory_space<vmem>>, vector<1x8x32xf32>
    %40 = vector.shape_cast %39 : vector<1x8x32xf32> to vector<8x32xf32>
    %41 = vector.shape_cast %38 : vector<8x32xf32> to vector<1x8x32xf32>
    tpu.vector_store %arg8[%c0_21, %c0_22, %c0_23], %41 {strides = array<i32>} : memref<1x8x32xf32, #tpu.memory_space<vmem>>, vector<1x8x32xf32>,
    return
  }
  func.func @transform_0(%arg0: i32) -> (i32, i32, i32) {
    %c0_i32 = arith.constant 0 : i32
    %c0_i32_0 = arith.constant 0 : i32
    %c0_i32_1 = arith.constant 0 : i32
    return %arg0, %c0_i32, %c0_i32_0 : i32, i32, i32
  }
  func.func @transform_1(%arg0: i32) -> (i32, i32) {
    %c0_i32 = arith.constant 0 : i32
    %c0_i32_0 = arith.constant 0 : i32
    %c0_i32_1 = arith.constant 0 : i32
    return %c0_i32, %c0_i32_0 : i32, i32
  }
  func.func @transform_2(%arg0: i32) -> (i32, i32) {
    %c0_i32 = arith.constant 0 : i32
    %c0_i32_0 = arith.constant 0 : i32
    %c0_i32_1 = arith.constant 0 : i32
    return %c0_i32, %c0_i32_0 : i32, i32
  }
  func.func @transform_3(%arg0: i32) -> (i32, i32) {
    %c0_i32 = arith.constant 0 : i32
    %c0_i32_0 = arith.constant 0 : i32
    %c0_i32_1 = arith.constant 0 : i32
    return %c0_i32, %c0_i32_0 : i32, i32
  }
  func.func @transform_4(%arg0: i32) -> (i32, i32) {
    %c0_i32 = arith.constant 0 : i32
    %c0_i32_0 = arith.constant 0 : i32
    %c0_i32_1 = arith.constant 0 : i32
    return %c0_i32, %c0_i32_0 : i32, i32
  }
  func.func @transform_5(%arg0: i32) -> (i32, i32) {
    %c0_i32 = arith.constant 0 : i32
    %c0_i32_0 = arith.constant 0 : i32
    %c0_i32_1 = arith.constant 0 : i32
    return %c0_i32, %c0_i32_0 : i32, i32
  }
  func.func @transform_6(%arg0: i32) -> (i32, i32) {
    %c0_i32 = arith.constant 0 : i32
    %c0_i32_0 = arith.constant 0 : i32
    %c0_i32_1 = arith.constant 0 : i32
    return %c0_i32, %c0_i32_0 : i32, i32
  }
  func.func @transform_7(%arg0: i32) -> (i32, i32, i32) {
    %c0_i32 = arith.constant 0 : i32
    %c0_i32_0 = arith.constant 0 : i32
    %c0_i32_1 = arith.constant 0 : i32
    return %arg0, %c0_i32, %c0_i32_0 : i32, i32, i32
  }
}

</mosaic_0001>

<bundles_post_ra>
// kernel: tpu_custom_call.1
= control target key start
LH: loop header
LB: loop body
LE: loop exit
PB: predicated region body
PF: predicated region fallthrough
CT: control target
= control target key end

     0   :  { %12 = vsyncpa [#allocation3], 0  ;;  %s1357_s0 = inlined_call_operand.hbm [shape: bf16[2,8,32], index: 0, kind: input, shape index: {}]   ;;  %s1358_s1 = inlined_call_operand.hbm [shape: bf16[32,32], index: 1, kind: input, shape index: {}]   ;;  %s1359_s2 = inlined_call_operand.vmem [shape: f32[1,32], index: 2, kind: input, shape index: {}]   ;;  %s1360_s3 = inlined_call_operand.hbm [shape: bf16[32,32], index: 3, kind: input, shape index: {}]   ;;  %s1361_s4 = inlined_call_operand.vmem [shape: f32[1,32], index: 4, kind: input, shape index: {}]   ;;  %s1362_s5 = inlined_call_operand.vmem [shape: bf16[32,32], index: 5, kind: input, shape index: {}]   ;;  %s1363_s6 = inlined_call_operand.vmem [shape: f32[1,32], index: 6, kind: input, shape index: {}]   ;;  %s1364_s7 = inlined_call_operand.hbm [shape: f32[2,8,32], index: 7, kind: output, shape index: {}]  }
   0x1   :  { %14 = vsyncpa [#allocation3 + $0x1], 0 }
   0x2   :  { %15 = vsyncpa [#allocation6], 0 }
   0x3   :  { %16 = vsyncpa [#allocation4], 0 }
   0x4   :  { %18 = vsyncpa [#allocation4 + $0x1], 0  ;;  %s1098_s24 = smov 0   ;;  %s1100_s25 = smov 0  }
   0x5   :  { %s1102_s26 = smov 0   ;;  %s1104_s27 = smov 0  }
   0x6 LB: > { %s1119_s28 = sadd.s32 4294967295, %s1048_s27   ;;  %s732_s29 = sadd.s32 4294967294, %s1048_s27   ;;  %s1048_s27 = sphi %s1104_s27, %s1384_s27   ;;  %s1044_s26 = sphi %s1102_s26, %s1383_s26   ;;  %s1040_s25 = sphi %s1100_s25, %s1382_s25   ;;  %s1036_s24 = sphi %s1098_s24, %s1381_s24  }
   0x7   : > { %p44_p0 = scmp.ne.s32.totalorder %s1040_s25, %s1036_s24  ;;  %p1365_p1 = scmp.eq.s32.totalorder %s1119_s28, 0 }
   0x8   : > { %p200_p3 = scmp.eq.s32.totalorder %s732_s29, 1  ;;  %p733_p5 = scmp.ge.s32.totalorder %s1048_s27, 1 }
   0x9   : > { %p1128_p4 = por %p1365_p1, %p44_p0  ;;  %p207_p7 = scmp.lt.s32.totalorder %s1048_s27, 3 }
   0xa   : > { %p1133_p6 = por %p200_p3, %p44_p0  ;;  %s1050_s10 = smov [#allocation5]  }
   0xb   : > { %s1368_s30 = scalar_select %p1128_p4, 1, 0 }
   0xc   : > { %s1369_s8 = scalar_select %p1133_p6, 1, 0 }
   0xd   : > { %p1138_p8 = pnand %p733_p5, %p207_p7  ;;  %s219_s11 = sshll.u32 %s1050_s10, 4  ;;  %s1142_s11 = int_to_ptr.vmem [resolvable:$true] %s219_s11 }
   0xe   : > { %s1051_s13 = smov [#allocation7]   ;;  %s892_s17 = scalar_lea.hbm %s1358_s1, 256 }
   0xf   : > { %p823_p9 = pneg %p1138_p8  ;;  %s235_s14 = sshll.u32 %s1051_s13, 4  ;;  %s1153_s14 = int_to_ptr.vmem [resolvable:$true] %s235_s14 }
  0x10   : > { %p893_p12 = scmp.ne.s32.totalorder %s1358_s1, %s892_s17  ;;  %p899_p5 = scmp.lt.u32.totalorder %s892_s17, %s1358_s1 }
  0x11   : > { %p1149_p11 = pnand %p823_p9, %p1365_p1 }
  0x13   : > { %p894_p13 = pneg %p1149_p11 }
  0x15   : > { %p895_p0 = pnand %p894_p13, %p893_p12 }
  0x17   : > { %p896_p3 = pneg %p895_p0 }
  0x19   : > { %p901_p7 = pnand %p899_p5, %p896_p3 }
  0x1b   : > { %904 = shalt.err (!%p901_p7)
}
  0x1c   : > { %s905_s22 = scalar_lea.vmem %s1142_s11, 256  ;;  %p913_p2 = scmp.lt.s32.totalorder %s1142_s11, %s1142_s11 }
  0x1d   : > { %p906_p9 = scmp.ne.s32.totalorder %s1142_s11, %s905_s22  ;;  %p914_p12 = scmp.lt.s32.totalorder %s905_s22, %s905_s22 }
  0x1f   : > { %p908_p10 = pnand %p906_p9, %p894_p13  ;;  %p915_p0 = por %p914_p12, %p913_p2 }
  0x21   : > { %p909_p1 = pneg %p908_p10 }
  0x23   : > { %p916_p6 = pnand %p915_p0, %p909_p1 }
  0x25   : > { %919 = shalt.err (!%p916_p6)
}
  0x26   : > { %s1052_s23 = smov 64   ;;  %s1053_s29 = smov 4  }
  0x27   : > { %826 = dma.hbm_to_vmem [thread:$0]  (!%p1149_p11), %s1358_s1, 256, %s1142_s11, [#allocation6], %s1052_s23, %s1052_s23, %s1053_s29  }
  0x28   : > { %s920_s17 = scalar_lea.hbm %s1360_s3, 256 }
  0x29   : > { %p921_p2 = scmp.ne.s32.totalorder %s1360_s3, %s920_s17  ;;  %p927_p10 = scmp.lt.u32.totalorder %s920_s17, %s1360_s3 }
  0x2b   : > { %p923_p1 = pnand %p921_p2, %p894_p13 }
  0x2d   : > { %p924_p6 = pneg %p923_p1 }
  0x2f   : > { %p929_p3 = pnand %p927_p10, %p924_p6 }
  0x31   : > { %932 = shalt.err (!%p929_p3)
}
  0x32   : > { %s933_s11 = scalar_lea.vmem %s1153_s14, 256  ;;  %p941_p12 = scmp.lt.s32.totalorder %s1153_s14, %s1153_s14 }
  0x33   : > { %p934_p5 = scmp.ne.s32.totalorder %s1153_s14, %s933_s11  ;;  %p942_p0 = scmp.lt.s32.totalorder %s933_s11, %s933_s11 }
  0x35   : > { %p936_p7 = pnand %p934_p5, %p894_p13  ;;  %p943_p2 = por %p942_p0, %p941_p12 }
  0x37   : > { %p937_p9 = pneg %p936_p7 }
  0x39   : > { %p944_p1 = pnand %p943_p2, %p937_p9 }
  0x3b   : > { %947 = shalt.err (!%p944_p1)
}
  0x3c   : > { %829 = dma.hbm_to_vmem [thread:$0]  (!%p1149_p11), %s1360_s3, 256, %s1153_s14, [#allocation6], %s1052_s23, %s1052_s23, %s1053_s29  }
  0x3d   : > { %s1208_s13 = sadd.s32 1, %s1048_s27   ;;  %s31_s12 = sadd.s32 1, %s1044_s26 }
  0x3e   : > { %s28_s15 = ssub.s32 %s1048_s27, %s1208_s13  ;;  %p38_p13 = scmp.ne.s32.totalorder %s1044_s26, %s1040_s25 }
  0x3f   : > { %p29_p6 = scmp.eq.s32.totalorder %s28_s15, 0  ;;  %p39_p10 = scmp.eq.s32.totalorder %s1048_s27, 0 }
  0x40   : > { %p1372_p3 = scmp.eq.s32.totalorder %s1119_s28, 1  ;;  %p840_p7 = scmp.lt.s32.totalorder %s1048_s27, 2 }
  0x41   : > { %s1224_s17 = scalar_select %p29_p6, %s1044_s26, %s31_s12  }
  0x42   : > { %p1218_p5 = por %p1372_p3, %p38_p13  ;;  %p40_p9 = por %p39_p10, %p38_p13 }
  0x43   : > { %s258_s18 = sand.u32 1, %s1044_s26   ;;  %s738_s14 = sshll.u32 %s1048_s27, 6 }
  0x44   : > { %s1373_s16 = scalar_select %p1218_p5, 1, 0 }
  0x45   : > { %s737_s19 = sshll.u32 %s258_s18, 2  ;;  %s1231_s20 = scalar_lea.hbm %s1357_s0, %s738_s14 }
  0x46   : > { %s262_s21 = scalar_lea.vmem [#allocation2], %s737_s19  ;;  %p1235_p11 = pnand %p840_p7, %p40_p9 }
  0x47   : > { %s269_s11 = sshll.u32 %s262_s21, 4  ;;  %s259_s10 = scalar_lea.sflag [#allocation3], %s258_s18  ;;  %s1233_s11 = int_to_ptr.vmem [resolvable:$true] %s269_s11 }
  0x48   : > { %s948_s12 = scalar_lea.hbm %s1231_s20, 64  ;;  %p950_p0 = pneg %p1235_p11 }
  0x49   : > { %p949_p12 = scmp.ne.s32.totalorder %s1231_s20, %s948_s12  ;;  %s953_s14 = scalar_lea.hbm %s1357_s0, 128 }
  0x4a   : > { %p954_p13 = scmp.lt.u32.totalorder %s1231_s20, %s1357_s0  ;;  %p955_p6 = scmp.lt.u32.totalorder %s953_s14, %s948_s12 }
  0x4b   : > { %p951_p2 = pnand %p950_p0, %p949_p12  ;;  %p957_p3 = scmp.lt.u32.totalorder %s948_s12, %s1231_s20 }
  0x4c   : > { %p956_p10 = por %p955_p6, %p954_p13 }
  0x4d   : > { %p952_p1 = pneg %p951_p2 }
  0x4e   : > { %p958_p7 = por %p957_p3, %p956_p10 }
  0x50   : > { %p959_p9 = pnand %p958_p7, %p952_p1 }
  0x52   : > { %962 = shalt.err (!%p959_p9)
}
  0x53   : > { %s963_s18 = scalar_lea.vmem %s1233_s11, 64  ;;  %s1054_s21 = smov [#allocation2]  }
  0x54   : > { %p964_p12 = scmp.ne.s32.totalorder %s1233_s11, %s963_s18  ;;  %s968_s15 = sshll.u32 %s1054_s21, 4  ;;  %s969_s15 = int_to_ptr.vmem [resolvable:$false] %s968_s15 }
  0x55   : > { %s970_s19 = scalar_lea.vmem %s969_s15, 128  ;;  %p971_p4 = scmp.lt.s32.totalorder %s1233_s11, %s969_s15 }
  0x56   : > { %p966_p2 = pnand %p964_p12, %p950_p0  ;;  %p972_p13 = scmp.lt.s32.totalorder %s970_s19, %s963_s18 }
  0x58   : > { %p967_p5 = pneg %p966_p2  ;;  %p973_p6 = por %p972_p13, %p971_p4 }
  0x5a   : > { %p974_p10 = pnand %p973_p6, %p967_p5 }
  0x5c   : > { %977 = shalt.err (!%p974_p10)
}
  0x5d   : > { %833 = dma.hbm_to_vmem [thread:$0]  (!%p1235_p11), %s1231_s20, 64, %s1233_s11, %s259_s10  }
  0x5e   : > { %278 = sbr.rel (%p1138_p8) target bundleno = 1096 (0x448), region = 48  ;;  %s1267_s12 = sand.u32 (!%p1138_p8), 1, %s1040_s25  }
  0x5f   : > { %s740_s14 = sshll.u32 (!%p1138_p8), %s1267_s12, 2  ;;  %s281_s23 = scalar_lea.sflag (!%p1138_p8), [#allocation3], %s1267_s12 }
  0x60   : > { %s284_s29 = scalar_lea.vmem (!%p1138_p8), [#allocation2], %s740_s14  ;;  %p1375_p4 = scmp.ne.s32.totalorder (!%p1138_p8), %s1368_s30, 0 }
  0x65   : > { %1023 = dma.done.wait (%p1375_p4), %s281_s23, 64  }
  0x66   : > { %1025 = vsyncadd (%p1375_p4), %s281_s23, 4294967232  ;;  %p1376_p5 = scmp.eq.s32.totalorder %s1119_s28, 0 }
  0x68   : > { %1027 = dma.done.wait (%p1376_p5), [#allocation6], 512   ;;  %p1377_p11 = pmov %p1376_p5 }
  0x69   : > { %v1055_v0 = vmov 0.0   ;;  %vm1056_vm0 = vmmov 0   ;;  %v882_v1 = vld [vmem:[#allocation7] sm:$0xff]   ;;  %v883_v2 = vld [vmem:[#allocation7 + $0x8] sm:$0xff]   ;;  %v884_v3 = vld [vmem:[#allocation5] sm:$0xff]   ;;  %vm348_vm1 = vcmask 261120  }
  0x6a   : > { %1029 = vsyncadd (%p1377_p11), [#allocation6], 4294966784  ;;  %783 = vmatprep.subr.bf16.mxu1 %v1055_v0  ;;  %775 = vmatprep.subr.bf16.mxu0 %v1055_v0  ;;  %v885_v4 = vld [vmem:[#allocation5 + $0x8] sm:$0xff]   ;;  %v324_v5 = vld [vmem:[%s284_s29] sm:$0xf]  ;;  %vm568_vm2 = vcmask 64512  }
  0x6b   : > { %787 = vmatprep.mubr.msk.bf16.mxu1 %vm1056_vm0, %v1055_v0  ;;  %779 = vmatprep.mubr.msk.bf16.mxu0 %vm1056_vm0, %v1055_v0  ;;  %v748_v6 = vld [vmem:[%s1361_s4] ss:$0 sm:$0xff]  ;;  %v887_v22 = vld [vmem:[%s1362_s5 + $0x8] sm:$0xff]   ;;  %vm584_vm3 = vcmask 1043456   ;;  %s743_s14 = sshll.u32 %s1267_s12, 3  ;;  %s759_s23 = sshll.u32 %s1119_s28, 7 }
  0x6c   : > { %784 = vmatpush3.bf16.msra.mxu1 %v882_v1  ;;  %776 = vmatpush3.bf16.msra.mxu0 %v884_v3  ;;  %v744_v11 = vld [vmem:[%s1359_s2] ss:$0 sm:$0xff]  ;;  %s322_s29 = scalar_lea.vmem [#allocation8], %s743_s14  ;;  %s1312_s11 = scalar_lea.hbm %s1364_s7, %s759_s23 }
  0x6d   : > { %785 = vmatprep.subr.bf16.mxu1 %v1055_v0  ;;  %777 = vmatprep.subr.bf16.mxu0 %v1055_v0  ;;  %v886_v21 = vld [vmem:[%s1362_s5] sm:$0xff]   ;;  %s643_s30 = sshll.u32 %s322_s29, 4  ;;  %s630_s22 = scalar_lea.sflag [#allocation4], %s1267_s12  ;;  %s1314_s30 = int_to_ptr.vmem [resolvable:$true] %s643_s30 }
  0x6e   : > { %v752_v37 = vld [vmem:[%s1363_s6] ss:$0 sm:$0xff]  ;;  %s978_s10 = scalar_lea.vmem %s1314_s30, 128  ;;  %p1378_p0 = scmp.ne.s32.totalorder %s1373_s16, 0 }
  0x6f   : > { %p979_p8 = scmp.ne.s32.totalorder %s1314_s30, %s978_s10  ;;  %s1057_s28 = smov [#allocation8]  }
  0x70   : > { %786 = vmatpush3.bf16.msra.mxu1 %v883_v2  ;;  %778 = vmatpush3.bf16.msra.mxu0 %v885_v4  ;;  %s982_s18 = sshll.u32 %s1057_s28, 4  ;;  %s983_s18 = int_to_ptr.vmem [resolvable:$false] %s982_s18 }
  0x71   : > { %799 = vmatprep.subr.bf16.mxu1 %v1055_v0  ;;  %791 = vmatprep.subr.bf16.mxu0 %v1055_v0  ;;  %p980_p1 = pnand %p979_p8, %p1378_p0  ;;  %s984_s21 = scalar_lea.vmem %s983_s18, 256 }
  0x72   : > { %p985_p7 = scmp.lt.s32.totalorder %s1314_s30, %s983_s18  ;;  %p986_p9 = scmp.lt.s32.totalorder %s984_s21, %s978_s10 }
  0x73   : > { %788 = vmatmul.mubr.msk.bf16.vlgmr.msra.gmra.mrb[0].mxu1 %vm348_vm1, %v324_v5  ;;  %780 = vmatmul.mubr.msk.bf16.vlgmr.msra.gmra.mrb[0].mxu0 %vm348_vm1, %v324_v5  ;;  %p981_p3 = pneg %p980_p1 }
  0x74   : > { %801 = vmatprep.mubr.msk.bf16.mxu1 %vm1056_vm0, %v1055_v0  ;;  %795 = vmatprep.mubr.msk.bf16.mxu0 %vm1056_vm0, %v1055_v0  ;;  %p987_p12 = por %p986_p9, %p985_p7 }
  0x75   : > { %792 = vmatpush3.bf16.msra.mxu0 %v886_v21 }
  0x76   : > { %793 = vmatprep.subr.bf16.mxu0 %v1055_v0  ;;  %p988_p2 = pnand %p987_p12, %p981_p3 }
  0x79   : > { %794 = vmatpush3.bf16.msra.mxu0 %v887_v22 }
  0x7a   : > { %805 = vmatprep.subr.bf16.mxu0 %v1055_v0 }
  0x7c   : > { %796 = vmatmul.mubr.msk.bf16.vlgmr.msra.gmra.mrb[4].mxu0 %vm348_vm1, %v324_v5 }
  0x7d   : > { %807 = vmatprep.mubr.msk.bf16.mxu0 %vm1056_vm0, %v1055_v0 }
 0x146   : > { %v450_v7 = vpop.f32.mrb[0].mxu1  ;;  %v386_v12 = vpop.f32.mrb[0].mxu0 }
 0x147   : > { %v451_v8 = vadd.f32 %v748_v6, %v450_v7  ;;  %v789_v9 = vpop.f32.mrb[1].mxu1  ;;  %v781_v15 = vpop.f32.mrb[1].mxu0  ;;  %v387_v18 = vadd.f32 %v744_v11, %v386_v12 }
 0x148   : > { %v453_v10 = vpop.f32.mrb[2].mxu1  ;;  %v389_v16 = vpop.f32.mrb[2].mxu0 }
 0x149   : > { %v456_v13 = vpack.c.bf16 %v451_v8, %v451_v8  ;;  %v790_v14 = vpop.f32.mrb[3].mxu1  ;;  %v782_v19 = vpop.f32.mrb[3].mxu0  ;;  %v392_v20 = vpack.c.bf16 %v387_v18, %v387_v18 }
 0x14b   : > { %v525_v17 = vsel %vm348_vm1, %v456_v13, 0 }
 0x14c   : > { %800 = vmatpush3.bf16.xpose.msra.mxu1 %v525_v17 }
 0x14f   : > { %v514_v34 = vpop.f32.mrb[4].mxu0 }
 0x150   : > { %v797_v35 = vpop.f32.mrb[5].mxu0  ;;  %v515_v39 = vadd.f32 %v752_v37, %v514_v34 }
 0x151   : > { %v517_v36 = vpop.f32.mrb[6].mxu0 }
 0x152   : > { %v798_v38 = vpop.f32.mrb[7].mxu0  ;;  %v520_v40 = vpack.c.bf16 %v515_v39, %v515_v39 }
 0x153   : > { %802 = vmatmul.mubr.msk.bf16.vlgmr.msra.gmra.mrb[4].mxu1 %vm348_vm1, %v392_v20 }
 0x154   : > { %v586_v41 = vsel %vm584_vm3, %v520_v40, 0 }
 0x155   : > { %806 = vmatpush3.bf16.msra.mxu0 %v586_v41 }
 0x226   : > { %v561_v23 = vpop.f32.mrb[4].mxu1 }
 0x227   : > { %v567_v24 = vmul.f32 0.17677669, %v561_v23  ;;  %v803_v25 = vpop.f32.mrb[5].mxu1 }
 0x228   : > { %v564_v26 = vpop.f32.mrb[6].mxu1 }
 0x229   : > { %v804_v27 = vpop.f32.mrb[7].mxu1  ;;  %v569_v28 = vsel %vm568_vm2, %v567_v24, -inf }
 0x22a   : > { %570 = vmax.xlane.f32.xlu0 %v569_v28 }
 0x2b7   : > { %v571_v29 = vpop.xlane.xlu0 %570 }
 0x2b8   : > { %v572_v30 = vsub.f32 %v567_v24, %v571_v29 }
 0x2ba   : > { %v573_v31 = vmul.f32 1.442695, %v572_v30 }
 0x2bc   : > { %888 = vpow2.f32 %v573_v31 }
 0x2c6   : > { %v889_v32 = vpop.eup %888 }
 0x2c7   : > { %v575_v33 = vsel %vm568_vm2, %v889_v32, 0.0 }
 0x2c8   : > { %576 = vadd.xlane.f32.xlu0 %v575_v33 }
 0x355   : > { %v577_v42 = vpop.xlane.xlu0 %576 }
 0x356   : > { %890 = vrcp.f32 %v577_v42 }
 0x360   : > { %v891_v43 = vpop.eup %890 }
 0x361   : > { %v579_v44 = vmul.f32 %v891_v43, %v889_v32 }
 0x363   : > { %v580_v45 = vpack.c.bf16 %v579_v44, %v579_v44 }
 0x365   : > { %808 = vmatmul.mubr.msk.bf16.vlgmr.msra.gmra.mrb[8].mxu0 %vm568_vm2, %v580_v45 }
 0x438   : > { %v622_v46 = vpop.f32.mrb[8].mxu0 }
 0x439   : > { %628 = vst.msk [vmem:[%s322_s29] sm:$0xff] %vm348_vm1, %v622_v46  ;;  %v809_v47 = vpop.f32.mrb[9].mxu0 }
 0x43a   : > { %v625_v48 = vpop.f32.mrb[10].mxu0 }
 0x43b   : > { %991 = shalt.err (!%p988_p2)
}
 0x43c   : > { %s992_s12 = scalar_lea.hbm %s1312_s11, 128  ;;  %s996_s14 = scalar_lea.hbm %s1364_s7, 256 }
 0x43d   : > { %p993_p13 = scmp.ne.s32.totalorder %s1312_s11, %s992_s12  ;;  %p997_p4 = scmp.lt.u32.totalorder %s1312_s11, %s1364_s7 }
 0x43e   : > { %p998_p5 = scmp.lt.u32.totalorder %s996_s14, %s992_s12  ;;  %p1000_p8 = scmp.lt.u32.totalorder %s992_s12, %s1312_s11 }
 0x43f   : > { %p994_p6 = pnand %p993_p13, %p1378_p0 }
 0x440   : > { %p999_p11 = por %p998_p5, %p997_p4 }
 0x441   : > { %p995_p10 = pneg %p994_p6 }
 0x442   : > { %p1001_p1 = por %p1000_p8, %p999_p11 }
 0x444   : > { %p1002_p3 = pnand %p1001_p1, %p995_p10 }
 0x446   : > { %1005 = shalt.err (!%p1002_p3)
}
 0x447   : > { %821 = dma.vmem_to_hbm [thread:$0]  (%p1378_p0), %s1314_s30, 128, %s1312_s11, %s630_s22   ;;  %v810_v49 = vpop.f32.mrb[11].mxu0 }
 0x448 PF: > { %s655_s9 = sand.u32 1, %s1036_s24   ;;  %p1379_p7 = scmp.ne.s32.totalorder %s1369_s8, 0 }
 0x449   : > { %p1380_p9 = scmp.ge.s32.totalorder %s1048_s27, 2  ;;  %s656_s20 = scalar_lea.sflag [#allocation4], %s655_s9 }
 0x44b   : > { %p835_p12 = pnand %p1380_p9, %p1379_p7 }
 0x44d   : > { %1031 = dma.done.wait (!%p835_p12), %s656_s20, 128  }
 0x44e   : > { %1033 = vsyncadd (!%p835_p12), %s656_s20, 4294967168  ;;  %p21_p2 = scmp.ge.s32.totalorder %s1208_s13, 4   ;;  %s1381_s24 = smov %s1040_s25 }
 0x44f   : > { %s1382_s25 = smov %s1044_s26  ;;  %s1383_s26 = smov %s1224_s17 }
 0x450   : > { %s1384_s27 = smov %s1208_s13  ;;  %23 = sbr.rel (!%p21_p2) target bundleno = 6 (0x6), region = 101 }
 0x457   :  { %661 = vsyncpa [#allocation3], 1 }
 0x458   :  { %663 = vsyncpa [#allocation3 + $0x1], 1 }
 0x459   :  { %664 = vsyncpa [#allocation6], 1 }
 0x45a   :  { %665 = vsyncpa [#allocation4], 1 }
 0x45b   :  { %667 = vsyncpa [#allocation4 + $0x1], 1 }

// kernel: tpu_custom_call.1
= control target key start
LH: loop header
LB: loop body
LE: loop exit
PB: predicated region body
PF: predicated region fallthrough
CT: control target
= control target key end

     0   :  { %12 = vsyncpa [#allocation3], 0  ;;  %s1357_s0 = inlined_call_operand.hbm [shape: bf16[2,8,32], index: 0, kind: input, shape index: {}]   ;;  %s1358_s1 = inlined_call_operand.hbm [shape: bf16[32,32], index: 1, kind: input, shape index: {}]   ;;  %s1359_s2 = inlined_call_operand.vmem [shape: f32[1,32], index: 2, kind: input, shape index: {}]   ;;  %s1360_s3 = inlined_call_operand.hbm [shape: bf16[32,32], index: 3, kind: input, shape index: {}]   ;;  %s1361_s4 = inlined_call_operand.vmem [shape: f32[1,32], index: 4, kind: input, shape index: {}]   ;;  %s1362_s5 = inlined_call_operand.vmem [shape: bf16[32,32], index: 5, kind: input, shape index: {}]   ;;  %s1363_s6 = inlined_call_operand.vmem [shape: f32[1,32], index: 6, kind: input, shape index: {}]   ;;  %s1364_s7 = inlined_call_operand.hbm [shape: f32[2,8,32], index: 7, kind: output, shape index: {}]  }
   0x1   :  { %14 = vsyncpa [#allocation3 + $0x1], 0 }
   0x2   :  { %15 = vsyncpa [#allocation6], 0 }
   0x3   :  { %16 = vsyncpa [#allocation4], 0 }
   0x4   :  { %18 = vsyncpa [#allocation4 + $0x1], 0  ;;  %s1098_s24 = smov 0   ;;  %s1100_s25 = smov 0  }
   0x5   :  { %s1102_s26 = smov 0   ;;  %s1104_s27 = smov 0  }
   0x6 LB: > { %s1119_s28 = sadd.s32 4294967295, %s1048_s27   ;;  %s732_s29 = sadd.s32 4294967294, %s1048_s27   ;;  %s1048_s27 = sphi %s1104_s27, %s1384_s27   ;;  %s1044_s26 = sphi %s1102_s26, %s1383_s26   ;;  %s1040_s25 = sphi %s1100_s25, %s1382_s25   ;;  %s1036_s24 = sphi %s1098_s24, %s1381_s24  }
   0x7   : > { %p44_p0 = scmp.ne.s32.totalorder %s1040_s25, %s1036_s24  ;;  %p1365_p1 = scmp.eq.s32.totalorder %s1119_s28, 0 }
   0x8   : > { %p200_p3 = scmp.eq.s32.totalorder %s732_s29, 1  ;;  %p733_p5 = scmp.ge.s32.totalorder %s1048_s27, 1 }
   0x9   : > { %p1128_p4 = por %p1365_p1, %p44_p0  ;;  %p207_p7 = scmp.lt.s32.totalorder %s1048_s27, 3 }
   0xa   : > { %p1133_p6 = por %p200_p3, %p44_p0  ;;  %s1050_s10 = smov [#allocation5]  }
   0xb   : > { %s1368_s30 = scalar_select %p1128_p4, 1, 0 }
   0xc   : > { %s1369_s8 = scalar_select %p1133_p6, 1, 0 }
   0xd   : > { %p1138_p8 = pnand %p733_p5, %p207_p7  ;;  %s219_s11 = sshll.u32 %s1050_s10, 4  ;;  %s1142_s11 = int_to_ptr.vmem [resolvable:$true] %s219_s11 }
   0xe   : > { %s1051_s13 = smov [#allocation7]   ;;  %s892_s17 = scalar_lea.hbm %s1358_s1, 256 }
   0xf   : > { %p823_p9 = pneg %p1138_p8  ;;  %s235_s14 = sshll.u32 %s1051_s13, 4  ;;  %s1153_s14 = int_to_ptr.vmem [resolvable:$true] %s235_s14 }
  0x10   : > { %p893_p12 = scmp.ne.s32.totalorder %s1358_s1, %s892_s17  ;;  %p899_p5 = scmp.lt.u32.totalorder %s892_s17, %s1358_s1 }
  0x11   : > { %p1149_p11 = pnand %p823_p9, %p1365_p1 }
  0x13   : > { %p894_p13 = pneg %p1149_p11 }
  0x15   : > { %p895_p0 = pnand %p894_p13, %p893_p12 }
  0x17   : > { %p896_p3 = pneg %p895_p0 }
  0x19   : > { %p901_p7 = pnand %p899_p5, %p896_p3 }
  0x1b   : > { %904 = shalt.err (!%p901_p7)
}
  0x1c   : > { %s905_s22 = scalar_lea.vmem %s1142_s11, 256  ;;  %p913_p2 = scmp.lt.s32.totalorder %s1142_s11, %s1142_s11 }
  0x1d   : > { %p906_p9 = scmp.ne.s32.totalorder %s1142_s11, %s905_s22  ;;  %p914_p12 = scmp.lt.s32.totalorder %s905_s22, %s905_s22 }
  0x1f   : > { %p908_p10 = pnand %p906_p9, %p894_p13  ;;  %p915_p0 = por %p914_p12, %p913_p2 }
  0x21   : > { %p909_p1 = pneg %p908_p10 }
  0x23   : > { %p916_p6 = pnand %p915_p0, %p909_p1 }
  0x25   : > { %919 = shalt.err (!%p916_p6)
}
  0x26   : > { %s1052_s23 = smov 64   ;;  %s1053_s29 = smov 4  }
  0x27   : > { %826 = dma.hbm_to_vmem [thread:$0]  (!%p1149_p11), %s1358_s1, 256, %s1142_s11, [#allocation6], %s1052_s23, %s1052_s23, %s1053_s29  }
  0x28   : > { %s920_s17 = scalar_lea.hbm %s1360_s3, 256 }
  0x29   : > { %p921_p2 = scmp.ne.s32.totalorder %s1360_s3, %s920_s17  ;;  %p927_p10 = scmp.lt.u32.totalorder %s920_s17, %s1360_s3 }
  0x2b   : > { %p923_p1 = pnand %p921_p2, %p894_p13 }
  0x2d   : > { %p924_p6 = pneg %p923_p1 }
  0x2f   : > { %p929_p3 = pnand %p927_p10, %p924_p6 }
  0x31   : > { %932 = shalt.err (!%p929_p3)
}
  0x32   : > { %s933_s11 = scalar_lea.vmem %s1153_s14, 256  ;;  %p941_p12 = scmp.lt.s32.totalorder %s1153_s14, %s1153_s14 }
  0x33   : > { %p934_p5 = scmp.ne.s32.totalorder %s1153_s14, %s933_s11  ;;  %p942_p0 = scmp.lt.s32.totalorder %s933_s11, %s933_s11 }
  0x35   : > { %p936_p7 = pnand %p934_p5, %p894_p13  ;;  %p943_p2 = por %p942_p0, %p941_p12 }
  0x37   : > { %p937_p9 = pneg %p936_p7 }
  0x39   : > { %p944_p1 = pnand %p943_p2, %p937_p9 }
  0x3b   : > { %947 = shalt.err (!%p944_p1)
}
  0x3c   : > { %829 = dma.hbm_to_vmem [thread:$0]  (!%p1149_p11), %s1360_s3, 256, %s1153_s14, [#allocation6], %s1052_s23, %s1052_s23, %s1053_s29  }
  0x3d   : > { %s1208_s13 = sadd.s32 1, %s1048_s27   ;;  %s31_s12 = sadd.s32 1, %s1044_s26 }
  0x3e   : > { %s28_s15 = ssub.s32 %s1048_s27, %s1208_s13  ;;  %p38_p13 = scmp.ne.s32.totalorder %s1044_s26, %s1040_s25 }
  0x3f   : > { %p29_p6 = scmp.eq.s32.totalorder %s28_s15, 0  ;;  %p39_p10 = scmp.eq.s32.totalorder %s1048_s27, 0 }
  0x40   : > { %p1372_p3 = scmp.eq.s32.totalorder %s1119_s28, 1  ;;  %p840_p7 = scmp.lt.s32.totalorder %s1048_s27, 2 }
  0x41   : > { %s1224_s17 = scalar_select %p29_p6, %s1044_s26, %s31_s12  }
  0x42   : > { %p1218_p5 = por %p1372_p3, %p38_p13  ;;  %p40_p9 = por %p39_p10, %p38_p13 }
  0x43   : > { %s258_s18 = sand.u32 1, %s1044_s26   ;;  %s738_s14 = sshll.u32 %s1048_s27, 6 }
  0x44   : > { %s1373_s16 = scalar_select %p1218_p5, 1, 0 }
  0x45   : > { %s737_s19 = sshll.u32 %s258_s18, 2  ;;  %s1231_s20 = scalar_lea.hbm %s1357_s0, %s738_s14 }
  0x46   : > { %s262_s21 = scalar_lea.vmem [#allocation2], %s737_s19  ;;  %p1235_p11 = pnand %p840_p7, %p40_p9 }
  0x47   : > { %s269_s11 = sshll.u32 %s262_s21, 4  ;;  %s259_s10 = scalar_lea.sflag [#allocation3], %s258_s18  ;;  %s1233_s11 = int_to_ptr.vmem [resolvable:$true] %s269_s11 }
  0x48   : > { %s948_s12 = scalar_lea.hbm %s1231_s20, 64  ;;  %p950_p0 = pneg %p1235_p11 }
  0x49   : > { %p949_p12 = scmp.ne.s32.totalorder %s1231_s20, %s948_s12  ;;  %s953_s14 = scalar_lea.hbm %s1357_s0, 128 }
  0x4a   : > { %p954_p13 = scmp.lt.u32.totalorder %s1231_s20, %s1357_s0  ;;  %p955_p6 = scmp.lt.u32.totalorder %s953_s14, %s948_s12 }
  0x4b   : > { %p951_p2 = pnand %p950_p0, %p949_p12  ;;  %p957_p3 = scmp.lt.u32.totalorder %s948_s12, %s1231_s20 }
  0x4c   : > { %p956_p10 = por %p955_p6, %p954_p13 }
  0x4d   : > { %p952_p1 = pneg %p951_p2 }
  0x4e   : > { %p958_p7 = por %p957_p3, %p956_p10 }
  0x50   : > { %p959_p9 = pnand %p958_p7, %p952_p1 }
  0x52   : > { %962 = shalt.err (!%p959_p9)
}
  0x53   : > { %s963_s18 = scalar_lea.vmem %s1233_s11, 64  ;;  %s1054_s21 = smov [#allocation2]  }
  0x54   : > { %p964_p12 = scmp.ne.s32.totalorder %s1233_s11, %s963_s18  ;;  %s968_s15 = sshll.u32 %s1054_s21, 4  ;;  %s969_s15 = int_to_ptr.vmem [resolvable:$false] %s968_s15 }
  0x55   : > { %s970_s19 = scalar_lea.vmem %s969_s15, 128  ;;  %p971_p4 = scmp.lt.s32.totalorder %s1233_s11, %s969_s15 }
  0x56   : > { %p966_p2 = pnand %p964_p12, %p950_p0  ;;  %p972_p13 = scmp.lt.s32.totalorder %s970_s19, %s963_s18 }
  0x58   : > { %p967_p5 = pneg %p966_p2  ;;  %p973_p6 = por %p972_p13, %p971_p4 }
  0x5a   : > { %p974_p10 = pnand %p973_p6, %p967_p5 }
  0x5c   : > { %977 = shalt.err (!%p974_p10)
}
  0x5d   : > { %833 = dma.hbm_to_vmem [thread:$0]  (!%p1235_p11), %s1231_s20, 64, %s1233_s11, %s259_s10  }
  0x5e   : > { %278 = sbr.rel (%p1138_p8) target bundleno = 1096 (0x448), region = 48  ;;  %s1267_s12 = sand.u32 (!%p1138_p8), 1, %s1040_s25  }
  0x5f   : > { %s740_s14 = sshll.u32 (!%p1138_p8), %s1267_s12, 2  ;;  %s281_s23 = scalar_lea.sflag (!%p1138_p8), [#allocation3], %s1267_s12 }
  0x60   : > { %s284_s29 = scalar_lea.vmem (!%p1138_p8), [#allocation2], %s740_s14  ;;  %p1375_p4 = scmp.ne.s32.totalorder (!%p1138_p8), %s1368_s30, 0 }
  0x65   : > { %1023 = dma.done.wait (%p1375_p4), %s281_s23, 64  }
  0x66   : > { %1025 = vsyncadd (%p1375_p4), %s281_s23, 4294967232  ;;  %p1376_p5 = scmp.eq.s32.totalorder %s1119_s28, 0 }
  0x68   : > { %1027 = dma.done.wait (%p1376_p5), [#allocation6], 512   ;;  %p1377_p11 = pmov %p1376_p5 }
  0x69   : > { %v1055_v0 = vmov 0.0   ;;  %vm1056_vm0 = vmmov 0   ;;  %v882_v1 = vld [vmem:[#allocation7] sm:$0xff]   ;;  %v883_v2 = vld [vmem:[#allocation7 + $0x8] sm:$0xff]   ;;  %v884_v3 = vld [vmem:[#allocation5] sm:$0xff]   ;;  %vm348_vm1 = vcmask 261120  }
  0x6a   : > { %1029 = vsyncadd (%p1377_p11), [#allocation6], 4294966784  ;;  %783 = vmatprep.subr.bf16.mxu1 %v1055_v0  ;;  %775 = vmatprep.subr.bf16.mxu0 %v1055_v0  ;;  %v885_v4 = vld [vmem:[#allocation5 + $0x8] sm:$0xff]   ;;  %v324_v5 = vld [vmem:[%s284_s29] sm:$0xf]  ;;  %vm568_vm2 = vcmask 64512  }
  0x6b   : > { %787 = vmatprep.mubr.msk.bf16.mxu1 %vm1056_vm0, %v1055_v0  ;;  %779 = vmatprep.mubr.msk.bf16.mxu0 %vm1056_vm0, %v1055_v0  ;;  %v748_v6 = vld [vmem:[%s1361_s4] ss:$0 sm:$0xff]  ;;  %v887_v22 = vld [vmem:[%s1362_s5 + $0x8] sm:$0xff]   ;;  %vm584_vm3 = vcmask 1043456   ;;  %s743_s14 = sshll.u32 %s1267_s12, 3  ;;  %s759_s23 = sshll.u32 %s1119_s28, 7 }
  0x6c   : > { %784 = vmatpush3.bf16.msra.mxu1 %v882_v1  ;;  %776 = vmatpush3.bf16.msra.mxu0 %v884_v3  ;;  %v744_v11 = vld [vmem:[%s1359_s2] ss:$0 sm:$0xff]  ;;  %s322_s29 = scalar_lea.vmem [#allocation8], %s743_s14  ;;  %s1312_s11 = scalar_lea.hbm %s1364_s7, %s759_s23 }
  0x6d   : > { %785 = vmatprep.subr.bf16.mxu1 %v1055_v0  ;;  %777 = vmatprep.subr.bf16.mxu0 %v1055_v0  ;;  %v886_v21 = vld [vmem:[%s1362_s5] sm:$0xff]   ;;  %s643_s30 = sshll.u32 %s322_s29, 4  ;;  %s630_s22 = scalar_lea.sflag [#allocation4], %s1267_s12  ;;  %s1314_s30 = int_to_ptr.vmem [resolvable:$true] %s643_s30 }
  0x6e   : > { %v752_v37 = vld [vmem:[%s1363_s6] ss:$0 sm:$0xff]  ;;  %s978_s10 = scalar_lea.vmem %s1314_s30, 128  ;;  %p1378_p0 = scmp.ne.s32.totalorder %s1373_s16, 0 }
  0x6f   : > { %p979_p8 = scmp.ne.s32.totalorder %s1314_s30, %s978_s10  ;;  %s1057_s28 = smov [#allocation8]  }
  0x70   : > { %786 = vmatpush3.bf16.msra.mxu1 %v883_v2  ;;  %778 = vmatpush3.bf16.msra.mxu0 %v885_v4  ;;  %s982_s18 = sshll.u32 %s1057_s28, 4  ;;  %s983_s18 = int_to_ptr.vmem [resolvable:$false] %s982_s18 }
  0x71   : > { %799 = vmatprep.subr.bf16.mxu1 %v1055_v0  ;;  %791 = vmatprep.subr.bf16.mxu0 %v1055_v0  ;;  %p980_p1 = pnand %p979_p8, %p1378_p0  ;;  %s984_s21 = scalar_lea.vmem %s983_s18, 256 }
  0x72   : > { %p985_p7 = scmp.lt.s32.totalorder %s1314_s30, %s983_s18  ;;  %p986_p9 = scmp.lt.s32.totalorder %s984_s21, %s978_s10 }
  0x73   : > { %788 = vmatmul.mubr.msk.bf16.vlgmr.msra.gmra.mrb[0].mxu1 %vm348_vm1, %v324_v5  ;;  %780 = vmatmul.mubr.msk.bf16.vlgmr.msra.gmra.mrb[0].mxu0 %vm348_vm1, %v324_v5  ;;  %p981_p3 = pneg %p980_p1 }
  0x74   : > { %801 = vmatprep.mubr.msk.bf16.mxu1 %vm1056_vm0, %v1055_v0  ;;  %795 = vmatprep.mubr.msk.bf16.mxu0 %vm1056_vm0, %v1055_v0  ;;  %p987_p12 = por %p986_p9, %p985_p7 }
  0x75   : > { %792 = vmatpush3.bf16.msra.mxu0 %v886_v21 }
  0x76   : > { %793 = vmatprep.subr.bf16.mxu0 %v1055_v0  ;;  %p988_p2 = pnand %p987_p12, %p981_p3 }
  0x79   : > { %794 = vmatpush3.bf16.msra.mxu0 %v887_v22 }
  0x7a   : > { %805 = vmatprep.subr.bf16.mxu0 %v1055_v0 }
  0x7c   : > { %796 = vmatmul.mubr.msk.bf16.vlgmr.msra.gmra.mrb[4].mxu0 %vm348_vm1, %v324_v5 }
  0x7d   : > { %807 = vmatprep.mubr.msk.bf16.mxu0 %vm1056_vm0, %v1055_v0 }
 0x146   : > { %v450_v7 = vpop.f32.mrb[0].mxu1  ;;  %v386_v12 = vpop.f32.mrb[0].mxu0 }
 0x147   : > { %v451_v8 = vadd.f32 %v748_v6, %v450_v7  ;;  %v789_v9 = vpop.f32.mrb[1].mxu1  ;;  %v781_v15 = vpop.f32.mrb[1].mxu0  ;;  %v387_v18 = vadd.f32 %v744_v11, %v386_v12 }
 0x148   : > { %v453_v10 = vpop.f32.mrb[2].mxu1  ;;  %v389_v16 = vpop.f32.mrb[2].mxu0 }
 0x149   : > { %v456_v13 = vpack.c.bf16 %v451_v8, %v451_v8  ;;  %v790_v14 = vpop.f32.mrb[3].mxu1  ;;  %v782_v19 = vpop.f32.mrb[3].mxu0  ;;  %v392_v20 = vpack.c.bf16 %v387_v18, %v387_v18 }
 0x14b   : > { %v525_v17 = vsel %vm348_vm1, %v456_v13, 0 }
 0x14c   : > { %800 = vmatpush3.bf16.xpose.msra.mxu1 %v525_v17 }
 0x14f   : > { %v514_v34 = vpop.f32.mrb[4].mxu0 }
 0x150   : > { %v797_v35 = vpop.f32.mrb[5].mxu0  ;;  %v515_v39 = vadd.f32 %v752_v37, %v514_v34 }
 0x151   : > { %v517_v36 = vpop.f32.mrb[6].mxu0 }
 0x152   : > { %v798_v38 = vpop.f32.mrb[7].mxu0  ;;  %v520_v40 = vpack.c.bf16 %v515_v39, %v515_v39 }
 0x153   : > { %802 = vmatmul.mubr.msk.bf16.vlgmr.msra.gmra.mrb[4].mxu1 %vm348_vm1, %v392_v20 }
 0x154   : > { %v586_v41 = vsel %vm584_vm3, %v520_v40, 0 }
 0x155   : > { %806 = vmatpush3.bf16.msra.mxu0 %v586_v41 }
 0x226   : > { %v561_v23 = vpop.f32.mrb[4].mxu1 }
 0x227   : > { %v567_v24 = vmul.f32 0.17677669, %v561_v23  ;;  %v803_v25 = vpop.f32.mrb[5].mxu1 }
 0x228   : > { %v564_v26 = vpop.f32.mrb[6].mxu1 }
 0x229   : > { %v804_v27 = vpop.f32.mrb[7].mxu1  ;;  %v569_v28 = vsel %vm568_vm2, %v567_v24, -inf }
 0x22a   : > { %570 = vmax.xlane.f32.xlu0 %v569_v28 }
 0x2b7   : > { %v571_v29 = vpop.xlane.xlu0 %570 }
 0x2b8   : > { %v572_v30 = vsub.f32 %v567_v24, %v571_v29 }
 0x2ba   : > { %v573_v31 = vmul.f32 1.442695, %v572_v30 }
 0x2bc   : > { %888 = vpow2.f32 %v573_v31 }
 0x2c6   : > { %v889_v32 = vpop.eup %888 }
 0x2c7   : > { %v575_v33 = vsel %vm568_vm2, %v889_v32, 0.0 }
 0x2c8   : > { %576 = vadd.xlane.f32.xlu0 %v575_v33 }
 0x355   : > { %v577_v42 = vpop.xlane.xlu0 %576 }
 0x356   : > { %890 = vrcp.f32 %v577_v42 }
 0x360   : > { %v891_v43 = vpop.eup %890 }
 0x361   : > { %v579_v44 = vmul.f32 %v891_v43, %v889_v32 }
 0x363   : > { %v580_v45 = vpack.c.bf16 %v579_v44, %v579_v44 }
 0x365   : > { %808 = vmatmul.mubr.msk.bf16.vlgmr.msra.gmra.mrb[8].mxu0 %vm568_vm2, %v580_v45 }
 0x438   : > { %v622_v46 = vpop.f32.mrb[8].mxu0 }
 0x439   : > { %628 = vst.msk [vmem:[%s322_s29] sm:$0xff] %vm348_vm1, %v622_v46  ;;  %v809_v47 = vpop.f32.mrb[9].mxu0 }
 0x43a   : > { %v625_v48 = vpop.f32.mrb[10].mxu0 }
 0x43b   : > { %991 = shalt.err (!%p988_p2)
}
 0x43c   : > { %s992_s12 = scalar_lea.hbm %s1312_s11, 128  ;;  %s996_s14 = scalar_lea.hbm %s1364_s7, 256 }
 0x43d   : > { %p993_p13 = scmp.ne.s32.totalorder %s1312_s11, %s992_s12  ;;  %p997_p4 = scmp.lt.u32.totalorder %s1312_s11, %s1364_s7 }
 0x43e   : > { %p998_p5 = scmp.lt.u32.totalorder %s996_s14, %s992_s12  ;;  %p1000_p8 = scmp.lt.u32.totalorder %s992_s12, %s1312_s11 }
 0x43f   : > { %p994_p6 = pnand %p993_p13, %p1378_p0 }
 0x440   : > { %p999_p11 = por %p998_p5, %p997_p4 }
 0x441   : > { %p995_p10 = pneg %p994_p6 }
 0x442   : > { %p1001_p1 = por %p1000_p8, %p999_p11 }
 0x444   : > { %p1002_p3 = pnand %p1001_p1, %p995_p10 }
 0x446   : > { %1005 = shalt.err (!%p1002_p3)
}
 0x447   : > { %821 = dma.vmem_to_hbm [thread:$0]  (%p1378_p0), %s1314_s30, 128, %s1312_s11, %s630_s22   ;;  %v810_v49 = vpop.f32.mrb[11].mxu0 }
 0x448 PF: > { %s655_s9 = sand.u32 1, %s1036_s24   ;;  %p1379_p7 = scmp.ne.s32.totalorder %s1369_s8, 0 }
 0x449   : > { %p1380_p9 = scmp.ge.s32.totalorder %s1048_s27, 2  ;;  %s656_s20 = scalar_lea.sflag [#allocation4], %s655_s9 }
 0x44b   : > { %p835_p12 = pnand %p1380_p9, %p1379_p7 }
 0x44d   : > { %1031 = dma.done.wait (!%p835_p12), %s656_s20, 128  }
 0x44e   : > { %1033 = vsyncadd (!%p835_p12), %s656_s20, 4294967168  ;;  %p21_p2 = scmp.ge.s32.totalorder %s1208_s13, 4   ;;  %s1381_s24 = smov %s1040_s25 }
 0x44f   : > { %s1382_s25 = smov %s1044_s26  ;;  %s1383_s26 = smov %s1224_s17 }
 0x450   : > { %s1384_s27 = smov %s1208_s13  ;;  %23 = sbr.rel (!%p21_p2) target bundleno = 6 (0x6), region = 101 }
 0x457   :  { %661 = vsyncpa [#allocation3], 1 }
 0x458   :  { %663 = vsyncpa [#allocation3 + $0x1], 1 }
 0x459   :  { %664 = vsyncpa [#allocation6], 1 }
 0x45a   :  { %665 = vsyncpa [#allocation4], 1 }
 0x45b   :  { %667 = vsyncpa [#allocation4 + $0x1], 1 }

</bundles_post_ra>
